<compile_context>
chip_gen: v7x
topology: tpu7x:2x2x1
jax: 0.10.0
libtpu: 0.0.40
codegen_flags: <defaults>
</compile_context>

<pallas_src>
import functools

import jax
import jax.numpy as jnp
from jax.experimental import pallas as pl
from jax.experimental.pallas import tpu as pltpu


def _round_up(x, m):
    return ((x + m - 1) // m) * m


# ----------------------------------------------------------------------------
# Pallas kernel
# ----------------------------------------------------------------------------
def critic_twin_kernel(
    state_ref, action_ref,
    avg_ref, inv_std_ref,
    w0s_ref, w0a_ref, b0_ref,
    w1_ref, b1_ref,
    w2_ref, b2_ref,
    out_ref,
):
    cdt = w0s_ref.dtype  # matmul-operand dtype (bf16 on the perf path, f32 otherwise)

    # state normalization: (state - avg) * inv_std   (fused multiply, f32 VPU)
    s = (state_ref[...] - avg_ref[...]) * inv_std_ref[...]

    # Layer 0: split-weight form avoids a lane-axis concat of (state, action).
    h = (
        jnp.dot(s.astype(cdt), w0s_ref[...], preferred_element_type=jnp.float32)
        + jnp.dot(action_ref[...].astype(cdt), w0a_ref[...],
                  preferred_element_type=jnp.float32)
        + b0_ref[...]
    )
    h = jnp.maximum(h, 0.0)

    # Layer 1 + ReLU
    h = jnp.dot(h.astype(cdt), w1_ref[...], preferred_element_type=jnp.float32) + b1_ref[...]
    h = jnp.maximum(h, 0.0)

    # Layer 2 with the ensemble mean folded into (hidden, 1) weights -> (TB, 1).
    q = jnp.dot(h.astype(cdt), w2_ref[...], preferred_element_type=jnp.float32) + b2_ref[...]

    out_ref[...] = q


# ----------------------------------------------------------------------------
# Parameter preparation (algebraic folds done once, outside the hot path)
# ----------------------------------------------------------------------------
def prepare_params(params, compute_dtype=jnp.bfloat16):
    state_dim = params["state_avg"].shape[-1]
    w0 = jnp.asarray(params["w0"], jnp.float32)
    w1 = jnp.asarray(params["w1"], jnp.float32)
    w2 = jnp.asarray(params["w2"], jnp.float32)
    # NOTE: no epsilon guard on std (matches the reference module); guard here if
    # state_std is estimated and may contain zeros.
    return {
        "avg": jnp.asarray(params["state_avg"], jnp.float32).reshape(1, state_dim),
        "inv_std": (1.0 / jnp.asarray(params["state_std"], jnp.float32)).reshape(1, state_dim),
        "w0s": w0[:state_dim].astype(compute_dtype),
        "w0a": w0[state_dim:].astype(compute_dtype),
        "b0": jnp.asarray(params["b0"], jnp.float32).reshape(1, -1),
        "w1": w1.astype(compute_dtype),
        "b1": jnp.asarray(params["b1"], jnp.float32).reshape(1, -1),
        # mean(h @ W + b) == h @ mean(W) + mean(b)
        "w2": w2.mean(axis=1, keepdims=True).astype(compute_dtype),
        "b2": jnp.asarray(params["b2"], jnp.float32).mean().reshape(1, 1),
    }


# ----------------------------------------------------------------------------
# Wrapper: batch-tiled pallas_call with resident weights
# ----------------------------------------------------------------------------
@functools.partial(jax.jit, static_argnames=("tb",))
def critic_twin_forward(state, action, kparams, tb=512):
    B, state_dim = state.shape
    action_dim = action.shape[1]

    # Batch tile: multiple of 8 (sublane); 512 amortizes per-step overhead while
    # staying far under v7x's 64 MiB VMEM with double-buffered in/out tiles.
    tb = min(tb, _round_up(B, 8))
    B_pad = _round_up(B, tb)
    if B_pad != B:
        state = jnp.pad(state, ((0, B_pad - B), (0, 0)))
        action = jnp.pad(action, ((0, B_pad - B), (0, 0)))

    grid = (B_pad // tb,)

    batch_spec = lambda d: pl.BlockSpec((tb, d), lambda i: (i, 0))
    # Constant index_map -> block stays resident in VMEM across grid steps.
    const_spec = lambda a: pl.BlockSpec(a.shape, lambda i: (0,) * a.ndim)

    out = pl.pallas_call(
        critic_twin_kernel,
        out_shape=jax.ShapeDtypeStruct((B_pad, 1), jnp.float32),
        grid=grid,
        in_specs=[
            batch_spec(state_dim),
            batch_spec(action_dim),
            const_spec(kparams["avg"]),
            const_spec(kparams["inv_std"]),
            const_spec(kparams["w0s"]),
            const_spec(kparams["w0a"]),
            const_spec(kparams["b0"]),
            const_spec(kparams["w1"]),
            const_spec(kparams["b1"]),
            const_spec(kparams["w2"]),
            const_spec(kparams["b2"]),
        ],
        out_specs=pl.BlockSpec((tb, 1), lambda i: (i, 0)),
        compiler_params=pltpu.CompilerParams(
            dimension_semantics=("parallel",),
            vmem_limit_bytes=32 * 1024 * 1024,
        ),
    )(
        state, action,
        kparams["avg"], kparams["inv_std"],
        kparams["w0s"], kparams["w0a"], kparams["b0"],
        kparams["w1"], kparams["b1"],
        kparams["w2"], kparams["b2"],
    )
    return out[:B]


# ----------------------------------------------------------------------------
# Deterministic parameter construction (mirrors CriticTwin.__init__ shapes)
# ----------------------------------------------------------------------------
def orthogonal(key, shape, gain=1.0):
    rows, cols = shape
    n = max(rows, cols)
    a = jax.random.normal(key, (n, n), dtype=jnp.float32)
    q, r = jnp.linalg.qr(a)
    q = q * jnp.sign(jnp.diag(r))
    return gain * q[:rows, :cols]


def make_params(key, state_dim, action_dim, net_dims, num_ensembles):
    dims = [state_dim + action_dim, *net_dims, num_ensembles]
    keys = jax.random.split(key, 2 * (len(dims) - 1))
    params = {
        "state_avg": jnp.zeros((state_dim,), jnp.float32),
        "state_std": jnp.ones((state_dim,), jnp.float32),
    }
    for i in range(len(dims) - 1):
        din, dout = dims[i], dims[i + 1]
        kw, kb = keys[2 * i], keys[2 * i + 1]
        if i == len(dims) - 2:
            # layer_init_with_orthogonal(layer, std=0.5, bias_const=1e-6);
            # PyTorch weight is (out, in) -> store transposed (in, out).
            w = orthogonal(kw, (dout, din), gain=0.5).T
            b = jnp.full((dout,), 1e-6, dtype=jnp.float32)
        else:
            bound = 1.0 / jnp.sqrt(jnp.float32(din))
            w = jax.random.uniform(kw, (din, dout), jnp.float32, -bound, bound)
            b = jax.random.uniform(kb, (dout,), jnp.float32, -bound, bound)
        params[f"w{i}"] = w
        params[f"b{i}"] = b
    return params


# ----------------------------------------------------------------------------
# Pure-JAX reference (original module structure, for sanity check)
# ----------------------------------------------------------------------------
def reference_forward(state, action, params):
    s = (state - params["state_avg"]) / params["state_std"]
    x = jnp.concatenate([s, action], axis=1)
    h = jnp.maximum(x @ params["w0"] + params["b0"], 0.0)
    h = jnp.maximum(h @ params["w1"] + params["b1"], 0.0)
    q = h @ params["w2"] + params["b2"]
    return jnp.mean(q, axis=-1, keepdims=True)


if __name__ == "__main__":
    batch = 8
    state_dim = 16
    action_dim = 4
    net_dims = [32, 32]
    num_ensembles = 8

    key = jax.random.PRNGKey(0)
    k_state, k_action, k_params, k_state2, k_action2 = jax.random.split(key, 5)

    state = jax.random.normal(k_state, (batch, state_dim), dtype=jnp.float32)
    action = jax.random.normal(k_action, (batch, action_dim), dtype=jnp.float32)
    params = make_params(k_params, state_dim, action_dim, net_dims, num_ensembles)
    ref = reference_forward(state, action, params)

    # --- f32 path: algebraically identical to the module (tight-ish tolerance;
    #     the split-w0 / folded-mean reassociation only changes rounding order).
    kp_f32 = prepare_params(params, compute_dtype=jnp.float32)
    out_f32 = jax.block_until_ready(critic_twin_forward(state, action, kp_f32))
    assert out_f32.shape == (batch, 1), out_f32.shape
    assert jnp.allclose(out_f32, ref, atol=1e-3, rtol=1e-3), (out_f32, ref)

    # --- bf16 matmul-operand perf path (f32 accumulation + f32 elementwise).
    kp_bf16 = prepare_params(params, compute_dtype=jnp.bfloat16)
    out_bf16 = jax.block_until_ready(critic_twin_forward(state, action, kp_bf16))
    assert out_bf16.shape == (batch, 1), out_bf16.shape
    assert jnp.allclose(out_bf16, ref, atol=5e-2, rtol=5e-2), (out_bf16, ref)

    # --- multi-tile grid + batch padding path (B not a multiple of the tile).
    batch2 = 20
    state2 = jax.random.normal(k_state2, (batch2, state_dim), dtype=jnp.float32)
    action2 = jax.random.normal(k_action2, (batch2, action_dim), dtype=jnp.float32)
    ref2 = reference_forward(state2, action2, params)
    out2 = jax.block_until_ready(critic_twin_forward(state2, action2, kp_bf16, tb=8))
    assert out2.shape == (batch2, 1), out2.shape
    assert jnp.allclose(out2, ref2, atol=5e-2, rtol=5e-2), (out2, ref2)

    print("KERNEL_OK")
</pallas_src>

<mosaic_0001>
module attributes {stable_mosaic.version = 11 : i64} {
  func.func @critic_twin_kernel(%arg0: i32, %arg1: memref<8x16xf32, #tpu.memory_space<vmem>>, %arg2: memref<8x4xf32, #tpu.memory_space<vmem>>, %arg3: memref<1x16xf32, #tpu.memory_space<vmem>>, %arg4: memref<1x16xf32, #tpu.memory_space<vmem>>, %arg5: memref<16x32xf32, #tpu.memory_space<vmem>>, %arg6: memref<4x32xf32, #tpu.memory_space<vmem>>, %arg7: memref<1x32xf32, #tpu.memory_space<vmem>>, %arg8: memref<32x32xf32, #tpu.memory_space<vmem>>, %arg9: memref<1x32xf32, #tpu.memory_space<vmem>>, %arg10: memref<32x1xf32, #tpu.memory_space<vmem>>, %arg11: memref<1x1xf32, #tpu.memory_space<vmem>>, %arg12: memref<8x1xf32, #tpu.memory_space<vmem>>) attributes {dimension_semantics = [#tpu.dimension_semantics<parallel>], iteration_bounds = array<i64: 1>, scalar_prefetch = 0 : i64, scratch_operands = 0 : i64, tpu.core_type = #tpu.core_type<tc>, window_params = [{transform_indices = @transform_0, window_bounds = array<i64: 8, 16>}, {transform_indices = @transform_1, window_bounds = array<i64: 8, 4>}, {pipeline_mode = #tpu.pipeline_mode<synchronous>, transform_indices = @transform_2, window_bounds = array<i64: 1, 16>}, {pipeline_mode = #tpu.pipeline_mode<synchronous>, transform_indices = @transform_3, window_bounds = array<i64: 1, 16>}, {pipeline_mode = #tpu.pipeline_mode<synchronous>, transform_indices = @transform_4, window_bounds = array<i64: 16, 32>}, {pipeline_mode = #tpu.pipeline_mode<synchronous>, transform_indices = @transform_5, window_bounds = array<i64: 4, 32>}, {pipeline_mode = #tpu.pipeline_mode<synchronous>, transform_indices = @transform_6, window_bounds = array<i64: 1, 32>}, {pipeline_mode = #tpu.pipeline_mode<synchronous>, transform_indices = @transform_7, window_bounds = array<i64: 32, 32>}, {pipeline_mode = #tpu.pipeline_mode<synchronous>, transform_indices = @transform_8, window_bounds = array<i64: 1, 32>}, {pipeline_mode = #tpu.pipeline_mode<synchronous>, transform_indices = @transform_9, window_bounds = array<i64: 32, 1>}, {pipeline_mode = #tpu.pipeline_mode<synchronous>, transform_indices = @transform_10, window_bounds = array<i64: 1, 1>}, {transform_indices = @transform_11, window_bounds = array<i64: 8, 1>}]} {
    %c0 = arith.constant 0 : index
    %c0_0 = arith.constant 0 : index
    %0 = vector.load %arg1[%c0, %c0_0] : memref<8x16xf32, #tpu.memory_space<vmem>>, vector<8x16xf32>
    %c0_1 = arith.constant 0 : index
    %c0_2 = arith.constant 0 : index
    %1 = vector.load %arg3[%c0_1, %c0_2] : memref<1x16xf32, #tpu.memory_space<vmem>>, vector<1x16xf32>
    %2 = vector.broadcast %1 : vector<1x16xf32> to vector<8x16xf32>
    %3 = arith.subf %0, %2 : vector<8x16xf32>
    %c0_3 = arith.constant 0 : index
    %c0_4 = arith.constant 0 : index
    %4 = vector.load %arg4[%c0_3, %c0_4] : memref<1x16xf32, #tpu.memory_space<vmem>>, vector<1x16xf32>
    %5 = vector.broadcast %4 : vector<1x16xf32> to vector<8x16xf32>
    %6 = arith.mulf %3, %5 : vector<8x16xf32>
    %c0_5 = arith.constant 0 : index
    %c0_6 = arith.constant 0 : index
    %7 = vector.load %arg5[%c0_5, %c0_6] : memref<16x32xf32, #tpu.memory_space<vmem>>, vector<16x32xf32>
    %cst = arith.constant dense<0.000000e+00> : vector<8x32xf32>
    %8 = tpu.matmul %6, %7, %cst {dimension_numbers = #tpu.dot_dimension_numbers<[1], [0], [0], [1], [0, 0, 1, 1], [], []>} : vector<8x16xf32>, vector<16x32xf32>, vector<8x32xf32> -> vector<8x32xf32>
    %c0_7 = arith.constant 0 : index
    %c0_8 = arith.constant 0 : index
    %9 = vector.load %arg2[%c0_7, %c0_8] : memref<8x4xf32, #tpu.memory_space<vmem>>, vector<8x4xf32>
    %c0_9 = arith.constant 0 : index
    %c0_10 = arith.constant 0 : index
    %10 = vector.load %arg6[%c0_9, %c0_10] : memref<4x32xf32, #tpu.memory_space<vmem>>, vector<4x32xf32>
    %cst_11 = arith.constant dense<0.000000e+00> : vector<8x32xf32>
    %11 = tpu.matmul %9, %10, %cst_11 {dimension_numbers = #tpu.dot_dimension_numbers<[1], [0], [0], [1], [0, 0, 1, 1], [], []>} : vector<8x4xf32>, vector<4x32xf32>, vector<8x32xf32> -> vector<8x32xf32>
    %12 = arith.addf %8, %11 : vector<8x32xf32>
    %c0_12 = arith.constant 0 : index
    %c0_13 = arith.constant 0 : index
    %13 = vector.load %arg7[%c0_12, %c0_13] : memref<1x32xf32, #tpu.memory_space<vmem>>, vector<1x32xf32>
    %14 = vector.broadcast %13 : vector<1x32xf32> to vector<8x32xf32>
    %15 = arith.addf %12, %14 : vector<8x32xf32>
    %cst_14 = arith.constant 0.000000e+00 : f32
    %16 = vector.broadcast %cst_14 : f32 to vector<8x32xf32>
    %17 = arith.maximumf %15, %16 : vector<8x32xf32>
    %c0_15 = arith.constant 0 : index
    %c0_16 = arith.constant 0 : index
    %18 = vector.load %arg8[%c0_15, %c0_16] : memref<32x32xf32, #tpu.memory_space<vmem>>, vector<32x32xf32>
    %cst_17 = arith.constant dense<0.000000e+00> : vector<8x32xf32>
    %19 = tpu.matmul %17, %18, %cst_17 {dimension_numbers = #tpu.dot_dimension_numbers<[1], [0], [0], [1], [0, 0, 1, 1], [], []>} : vector<8x32xf32>, vector<32x32xf32>, vector<8x32xf32> -> vector<8x32xf32>
    %c0_18 = arith.constant 0 : index
    %c0_19 = arith.constant 0 : index
    %20 = vector.load %arg9[%c0_18, %c0_19] : memref<1x32xf32, #tpu.memory_space<vmem>>, vector<1x32xf32>
    %21 = vector.broadcast %20 : vector<1x32xf32> to vector<8x32xf32>
    %22 = arith.addf %19, %21 : vector<8x32xf32>
    %cst_20 = arith.constant 0.000000e+00 : f32
    %23 = vector.broadcast %cst_20 : f32 to vector<8x32xf32>
    %24 = arith.maximumf %22, %23 : vector<8x32xf32>
    %c0_21 = arith.constant 0 : index
    %c0_22 = arith.constant 0 : index
    %25 = vector.load %arg10[%c0_21, %c0_22] : memref<32x1xf32, #tpu.memory_space<vmem>>, vector<32x1xf32>
    %cst_23 = arith.constant dense<0.000000e+00> : vector<8x1xf32>
    %26 = tpu.matmul %24, %25, %cst_23 {dimension_numbers = #tpu.dot_dimension_numbers<[1], [0], [0], [1], [0, 0, 1, 1], [], []>} : vector<8x32xf32>, vector<32x1xf32>, vector<8x1xf32> -> vector<8x1xf32>
    %c0_24 = arith.constant 0 : index
    %c0_25 = arith.constant 0 : index
    %27 = vector.load %arg11[%c0_24, %c0_25] : memref<1x1xf32, #tpu.memory_space<vmem>>, vector<1x1xf32>
    %28 = vector.broadcast %27 : vector<1x1xf32> to vector<8x1xf32>
    %29 = arith.addf %26, %28 : vector<8x1xf32>
    %c0_26 = arith.constant 0 : index
    %c0_27 = arith.constant 0 : index
    %30 = vector.load %arg12[%c0_26, %c0_27] : memref<8x1xf32, #tpu.memory_space<vmem>>, vector<8x1xf32>
    tpu.vector_store %arg12[%c0_26, %c0_27], %29 {strides = array<i32>} : memref<8x1xf32, #tpu.memory_space<vmem>>, vector<8x1xf32>,
    return
  }
  func.func @transform_0(%arg0: i32) -> (i32, i32) {
    %c0_i32 = arith.constant 0 : i32
    %c0_i32_0 = arith.constant 0 : i32
    return %arg0, %c0_i32 : i32, i32
  }
  func.func @transform_1(%arg0: i32) -> (i32, i32) {
    %c0_i32 = arith.constant 0 : i32
    %c0_i32_0 = arith.constant 0 : i32
    return %arg0, %c0_i32 : i32, i32
  }
  func.func @transform_2(%arg0: i32) -> (i32, i32) {
    %c0_i32 = arith.constant 0 : i32
    %c0_i32_0 = arith.constant 0 : i32
    %c0_i32_1 = arith.constant 0 : i32
    return %c0_i32, %c0_i32_0 : i32, i32
  }
  func.func @transform_3(%arg0: i32) -> (i32, i32) {
    %c0_i32 = arith.constant 0 : i32
    %c0_i32_0 = arith.constant 0 : i32
    %c0_i32_1 = arith.constant 0 : i32
    return %c0_i32, %c0_i32_0 : i32, i32
  }
  func.func @transform_4(%arg0: i32) -> (i32, i32) {
    %c0_i32 = arith.constant 0 : i32
    %c0_i32_0 = arith.constant 0 : i32
    %c0_i32_1 = arith.constant 0 : i32
    return %c0_i32, %c0_i32_0 : i32, i32
  }
  func.func @transform_5(%arg0: i32) -> (i32, i32) {
    %c0_i32 = arith.constant 0 : i32
    %c0_i32_0 = arith.constant 0 : i32
    %c0_i32_1 = arith.constant 0 : i32
    return %c0_i32, %c0_i32_0 : i32, i32
  }
  func.func @transform_6(%arg0: i32) -> (i32, i32) {
    %c0_i32 = arith.constant 0 : i32
    %c0_i32_0 = arith.constant 0 : i32
    %c0_i32_1 = arith.constant 0 : i32
    return %c0_i32, %c0_i32_0 : i32, i32
  }
  func.func @transform_7(%arg0: i32) -> (i32, i32) {
    %c0_i32 = arith.constant 0 : i32
    %c0_i32_0 = arith.constant 0 : i32
    %c0_i32_1 = arith.constant 0 : i32
    return %c0_i32, %c0_i32_0 : i32, i32
  }
  func.func @transform_8(%arg0: i32) -> (i32, i32) {
    %c0_i32 = arith.constant 0 : i32
    %c0_i32_0 = arith.constant 0 : i32
    %c0_i32_1 = arith.constant 0 : i32
    return %c0_i32, %c0_i32_0 : i32, i32
  }
  func.func @transform_9(%arg0: i32) -> (i32, i32) {
    %c0_i32 = arith.constant 0 : i32
    %c0_i32_0 = arith.constant 0 : i32
    %c0_i32_1 = arith.constant 0 : i32
    return %c0_i32, %c0_i32_0 : i32, i32
  }
  func.func @transform_10(%arg0: i32) -> (i32, i32) {
    %c0_i32 = arith.constant 0 : i32
    %c0_i32_0 = arith.constant 0 : i32
    %c0_i32_1 = arith.constant 0 : i32
    return %c0_i32, %c0_i32_0 : i32, i32
  }
  func.func @transform_11(%arg0: i32) -> (i32, i32) {
    %c0_i32 = arith.constant 0 : i32
    %c0_i32_0 = arith.constant 0 : i32
    return %arg0, %c0_i32 : i32, i32
  }
}

</mosaic_0001>

<bundles_post_ra>
// kernel: critic_twin_forward.1
= control target key start
LH: loop header
LB: loop body
LE: loop exit
PB: predicated region body
PF: predicated region fallthrough
CT: control target
= control target key end

     0   :  { %s647_s0 = inlined_call_operand.vmem [shape: f32[8,16], index: 0, kind: input, shape index: {}]   ;;  %s648_s1 = inlined_call_operand.vmem [shape: f32[8,4], index: 1, kind: input, shape index: {}]   ;;  %s649_s2 = inlined_call_operand.vmem [shape: f32[1,16], index: 2, kind: input, shape index: {}]   ;;  %s650_s3 = inlined_call_operand.vmem [shape: f32[1,16], index: 3, kind: input, shape index: {}]   ;;  %s651_s4 = inlined_call_operand.vmem [shape: f32[16,32], index: 4, kind: input, shape index: {}]   ;;  %s652_s5 = inlined_call_operand.vmem [shape: f32[4,32], index: 5, kind: input, shape index: {}]   ;;  %s653_s6 = inlined_call_operand.vmem [shape: f32[1,32], index: 6, kind: input, shape index: {}]   ;;  %s654_s7 = inlined_call_operand.vmem [shape: f32[32,32], index: 7, kind: input, shape index: {}]   ;;  %s655_s8 = inlined_call_operand.hbm [shape: f32[1,32], index: 8, kind: input, shape index: {}]   ;;  %s656_s9 = inlined_call_operand.vmem [shape: f32[32,1], index: 9, kind: input, shape index: {}]   ;;  %s657_s10 = inlined_call_operand.<no memory space> [shape: f32[1,1], index: 10, kind: input, shape index: {}]   ;;  %s658_s11 = inlined_call_operand.vmem [shape: f32[8,1], index: 11, kind: output, shape index: {}]  }
   0x1   :  { %v16_v0 = vstv %s657_s10 }
   0x2   :  { %17 = vst [vmem:[#allocation2] sm:$0x1] %v16_v0 }
   0x3   :  { %18 = vsyncpa [#allocation4], 0  ;;  %s513_s19 = smov [#allocation3]   ;;  %s489_s23 = scalar_lea.hbm %s655_s8, 16 }
   0x4   :  { %s41_s20 = sshll.u32 %s513_s19, 4  ;;  %p490_p0 = scmp.ne.s32.totalorder %s655_s8, %s489_s23  ;;  %s42_s20 = int_to_ptr.vmem [resolvable:$true] %s41_s20 }
   0x5   :  { %p493_p1 = scmp.lt.u32.totalorder %s489_s23, %s655_s8 }
   0x7   :  { %p495_p2 = pnand %p493_p1, %p490_p0 }
   0x9   :  { %498 = shalt.err (!%p495_p2)
}
   0xa   :  { %s499_s10 = scalar_lea.vmem %s42_s20, 16  ;;  %s503_s28 = scalar_lea.vmem %s42_s20, 32 }
   0xb   :  { %p500_p3 = scmp.ne.s32.totalorder %s42_s20, %s499_s10  ;;  %p504_p4 = scmp.lt.s32.totalorder %s42_s20, %s42_s20 }
   0xc   :  { %p505_p5 = scmp.lt.s32.totalorder %s503_s28, %s499_s10 }
   0xe   :  { %p506_p6 = por %p505_p5, %p504_p4 }
  0x10   :  { %p507_p7 = pnand %p506_p6, %p500_p3 }
  0x12   :  { %510 = shalt.err (!%p507_p7)
}
  0x13   :  { %44 = dma.hbm_to_vmem [thread:$0]  %s655_s8, 16, %s42_s20, [#allocation4]  }
  0x14   :  { %511 = dma.done.wait [#allocation4], 16  }
  0x15   :  { %512 = vsyncadd [#allocation4], 4294967280  ;;  %v514_v1 = vmov 0.0|0.0   ;;  %v515_v2 = vmov 0.0   ;;  %vm516_vm0 = vmmov 0   ;;  %vm77_vm1 = vcmask 1043456  }
  0x16   :  { %470 = vmatprep.subr.bf16.mxu1 %v514_v1  ;;  %436 = vmatprep.subr.mxu0 %v515_v2  ;;  %vm73_vm2 = vcmask 31744   ;;  %v69_v3 = vld [vmem:[%s651_s4] sm:$0xff]  ;;  %v70_v4 = vld [vmem:[%s651_s4 + $0x8] sm:$0xff]  ;;  %vm151_vm3 = vcmask 130048   ;;  %v236_v16 = vld [vmem:[%s654_s7 + $0x10] sm:$0xff]  ;;  %vm245_vm4 = vcmask 261120  }
  0x17   :  { %438 = vmatprep.mubr.msk.f32.mxu0 %vm516_vm0, %v515_v2  ;;  %445 = vmatprep.mubr.msk.f32.mxu1 %vm516_vm0, %v515_v2  ;;  %v72_v5 = vld [vmem:[%s652_s5] sm:$0xf]  ;;  %v471_v6 = vpack.c.bf16 %v70_v4, %v69_v3  ;;  %v235_v14 = vld [vmem:[%s654_s7 + $0x8] sm:$0xff]  ;;  %v237_v17 = vld [vmem:[%s654_s7 + $0x18] sm:$0xff]  ;;  %vm404_vm5 = vcmask 7168  }
  0x18   :  { %437 = vmatpush3.msk.msra.mxu0 %vm77_vm1, %v72_v5  ;;  %v71_v7 = vld [vmem:[%s648_s1] sm:$0xff]  ;;  %v477_v18 = vpack.c.bf16 %v237_v17, %v236_v16  ;;  %v321_v20 = vld [vmem:[%s656_s9 + $0x8] sm:$0xff]  ;;  %v322_v30 = vld [vmem:[%s656_s9 + $0x10] sm:$0xff] }
  0x19   :  { %v52_v8 = vld [vmem:[%s647_s0] sm:$0xff]  ;;  %439 = vmatmul.mubr.msk.f32.vlgmr.msra.gmra.mrb[0].mxu0 %vm73_vm2, %v71_v7  ;;  %473 = vmatprep.subr.bf16.mxu0 %v514_v1  ;;  %v323_v31 = vld [vmem:[%s656_s9 + $0x18] sm:$0xff] }
  0x1a   :  { %v411_v9 = vld [vmem:[%s649_s2] ss:$0 sm:$0xff]  ;;  %472 = vmatpush3.bf16.msra.mxu1 %v471_v6  ;;  %456 = vmatprep.mubr.msk.f32.mxu0 %vm516_vm0, %v515_v2  ;;  %v483_v32 = vpack.c.bf16 %v323_v31, %v322_v30  ;;  %v417_v33 = vld [vmem:[#allocation3] ss:$0 sm:$0xff] }
  0x1b   :  { %v60_v10 = vsub.f32 %v52_v8, %v411_v9  ;;  %v412_v11 = vld [vmem:[%s650_s3] ss:$0 sm:$0xff]  ;;  %479 = vmatprep.subr.bf16.mxu1 %v514_v1 }
  0x1c   :  { %v234_v13 = vld [vmem:[%s654_s7] sm:$0xff] }
  0x1d   :  { %v68_v12 = vmul.f32 %v412_v11, %v60_v10  ;;  %v474_v15 = vpack.c.bf16 %v235_v14, %v234_v13  ;;  %v320_v19 = vld [vmem:[%s656_s9] sm:$0xff] }
  0x1e   :  { %v480_v21 = vpack.c.bf16 %v321_v20, %v320_v19  ;;  %v416_v25 = vld [vmem:[%s653_s6] ss:$0 sm:$0xff] }
  0x1f   :  { %446 = vmatmul.mubr.msk.f32.vlgmr.msra.gmra.mrb[0].mxu1 %vm151_vm3, %v68_v12  ;;  %475 = vmatpush3.bf16.msra.mxu0 %v474_v15  ;;  %v419_v38 = vld [vmem:[#allocation2] ss:$0 sm:$0xff] }
  0x20   :  { %467 = vmatprep.mubr.msk.f32.mxu1 %vm516_vm0, %v515_v2  ;;  %476 = vmatprep.subr.bf16.mxu0 %v514_v1 }
  0x21   :  { %481 = vmatpush3.bf16.msra.mxu1 %v480_v21 }
  0x22   :  { %482 = vmatprep.subr.bf16.mxu1 %v514_v1 }
  0x23   :  { %478 = vmatpush3.bf16.msra.mxu0 %v477_v18 }
  0x25   :  { %484 = vmatpush3.bf16.msra.mxu1 %v483_v32 }
  0xec   :  { %v147_v22 = vpop.f32.mrb[0].mxu0 }
  0xed   :  { %v440_v23 = vpop.f32.mrb[1].mxu0 }
  0xf2   :  { %v221_v24 = vpop.f32.mrb[0].mxu1 }
  0xf3   :  { %v222_v26 = vadd.f32 %v221_v24, %v147_v22  ;;  %v447_v27 = vpop.f32.mrb[1].mxu1 }
  0xf5   :  { %v232_v28 = vadd.f32 %v416_v25, %v222_v26 }
  0xf7   :  { %v233_v29 = vmax.f32 %v232_v28, 0.0 }
  0xf9   :  { %457 = vmatmul.mubr.msk.f32.vlgmr.msra.gmra.mrb[2].mxu0 %vm245_vm4, %v233_v29 }
 0x1cc   :  { %v315_v34 = vpop.f32.mrb[2].mxu0 }
 0x1cd   :  { %v316_v35 = vadd.f32 %v417_v33, %v315_v34  ;;  %v458_v36 = vpop.f32.mrb[3].mxu0 }
 0x1cf   :  { %v319_v37 = vmax.f32 %v316_v35, 0.0 }
 0x1d1   :  { %468 = vmatmul.mubr.msk.f32.vlgmr.msra.gmra.mrb[2].mxu1 %vm245_vm4, %v319_v37 }
 0x2a4   :  { %v400_v39 = vpop.f32.mrb[2].mxu1 }
 0x2a5   :  { %v401_v40 = vadd.f32 %v419_v38, %v400_v39  ;;  %v469_v41 = vpop.f32.mrb[3].mxu1 }
 0x2a7   :  { %405 = vst.msk [vmem:[%s658_s11] sm:$0xff] %vm404_vm5, %v401_v40 }
 0x2a8   :  { %410 = vsyncpa [#allocation4], 1 }

</bundles_post_ra>
